<compile_context>
chip_gen: v5e
topology: v5e:2x2
jax: 0.10.0
libtpu: 0.0.40
codegen_flags: <defaults>
</compile_context>

<pallas_src>
import jax
import jax.numpy as jnp
from jax.experimental import pallas as pl
from jax.experimental.pallas import tpu as pltpu


def bert_output_kernel(h_ref, w_ref, p_ref, res_ref, o_ref):
    # Dense: [tm, K] @ [K, N] -> [tm, N]. Cast the activation tile to bf16 in
    # VMEM (avoids an extra HBM pass); weight arrives bf16; f32 MXU accumulate.
    x = jnp.dot(h_ref[...].astype(w_ref.dtype), w_ref[...],
                preferred_element_type=jnp.float32)
    x = x + p_ref[0:1, :]                        # bias (1, N) broadcasts over rows
    # TODO(synk): dropout is identity in eval mode; training-mode RNG masking
    # (pltpu.prng_seed / prng_random_bits) intentionally omitted.
    x = x + res_ref[...].astype(jnp.float32)     # residual add

    # LayerNorm over the last axis (eps = 1e-12), two passes over x:
    #   pass 1: per-row sum(x) and sum(x*x)
    #   pass 2: fused affine y = x * scale + shift
    n = x.shape[-1]
    s1 = jnp.sum(x, axis=-1, keepdims=True)
    s2 = jnp.sum(x * x, axis=-1, keepdims=True)
    mean = s1 * (1.0 / n)
    var = jnp.maximum(s2 * (1.0 / n) - mean * mean, 0.0)
    inv = jax.lax.rsqrt(var + 1e-12)
    scale = inv * p_ref[1:2, :]                  # gamma folded into inv-std
    shift = p_ref[2:3, :] - mean * scale         # beta - mean * scale
    o_ref[...] = (x * scale + shift).astype(o_ref.dtype)


def _round_up(x, m):
    return (x + m - 1) // m * m


def bert_output(hidden_states, input_tensor, weight, bias, gamma, beta, *, tm=256):
    """hidden_states: [M, K], input_tensor: [M, N], weight: [K, N] (pre-transposed
    nn.Linear weight), bias/gamma/beta: [N]. Returns [M, N] in input_tensor.dtype."""
    M, K = hidden_states.shape
    N = input_tensor.shape[1]
    out_dtype = input_tensor.dtype

    # Row-tile size: keep it large (MXU-friendly, fewer grid steps) but shrink
    # until the grid has >= 4 steps when M allows, so v7x's 2 TensorCores can
    # both be fed by the "parallel" row axis. tm must be a multiple of 8
    # (f32/bf16-safe sublane tiling for the activation block).
    tm = max(8, min(_round_up(tm, 8), _round_up(M, 8)))
    while pl.cdiv(M, tm) < 4 and tm > 8:
        tm = max(8, _round_up(tm // 2, 8))
    grid_m = pl.cdiv(M, tm)

    # Grid-resident weight: cast once to bf16 (halves VMEM + HBM for the weight).
    w = weight.astype(jnp.bfloat16)
    # bias/gamma/beta fused into one full (8, N) f32 sublane tile (rows 3..7 unused).
    params = jnp.zeros((8, N), jnp.float32)
    params = params.at[0].set(bias.astype(jnp.float32))
    params = params.at[1].set(gamma.astype(jnp.float32))
    params = params.at[2].set(beta.astype(jnp.float32))

    itm_h = jnp.dtype(hidden_states.dtype).itemsize
    itm_res = jnp.dtype(input_tensor.dtype).itemsize
    itm_out = jnp.dtype(out_dtype).itemsize

    # VMEM budget: default double-buffering on every operand (incl. the
    # constant weight/params blocks) plus rough in-kernel intermediates,
    # capped at 56 MiB to leave headroom on v7x's 64 MiB per-core VMEM.
    vmem_need = (2 * tm * K * itm_h            # activation tiles
                 + 2 * K * N * 2               # bf16 weight (2 bufs budgeted)
                 + 2 * 8 * N * 4               # params
                 + 2 * tm * N * itm_res        # residual tiles
                 + 2 * tm * N * itm_out        # output tiles
                 + tm * K * 2 + 4 * tm * N * 4)  # in-kernel cast + f32 temps
    vmem_limit = int(min(max(vmem_need + (8 << 20), 32 << 20), 56 << 20))

    bytes_accessed = int(M * K * itm_h + K * N * 2 + 8 * N * 4
                         + M * N * itm_res + M * N * itm_out)
    cost = pl.CostEstimate(flops=2 * M * K * N, transcendentals=M,
                           bytes_accessed=bytes_accessed)

    out = pl.pallas_call(
        bert_output_kernel,
        out_shape=jax.ShapeDtypeStruct((M, N), out_dtype),
        grid_spec=pltpu.PrefetchScalarGridSpec(
            num_scalar_prefetch=0,
            grid=(grid_m,),
            in_specs=[
                pl.BlockSpec((tm, K), lambda i: (i, 0)),   # activations (source dtype)
                pl.BlockSpec((K, N), lambda i: (0, 0)),    # bf16 weight (resident block)
                pl.BlockSpec((8, N), lambda i: (0, 0)),    # bias/gamma/beta
                pl.BlockSpec((tm, N), lambda i: (i, 0)),   # residual (source dtype)
            ],
            out_specs=pl.BlockSpec((tm, N), lambda i: (i, 0)),
        ),
        compiler_params=pltpu.CompilerParams(
            dimension_semantics=("parallel",),
            vmem_limit_bytes=vmem_limit,
        ),
        cost_estimate=cost,
    )(hidden_states, w, params, input_tensor)

    return out


if __name__ == "__main__":
    # Small BERT-ish config: batch=2, seq=8, hidden=32, intermediate=64
    batch, seq, hidden, intermediate = 2, 8, 32, 64
    M = batch * seq

    key = jax.random.PRNGKey(0)
    k1, k2, k3, k4 = jax.random.split(key, 4)

    hidden_states = jax.random.normal(k1, (M, intermediate), dtype=jnp.float32)
    input_tensor = jax.random.normal(k2, (M, hidden), dtype=jnp.float32)

    # nn.Linear weight is [hidden, intermediate]; the kernel takes its transpose
    # [intermediate, hidden] for the x @ W layout.
    w_t = (jax.random.normal(k3, (intermediate, hidden), dtype=jnp.float32)
           * (1.0 / jnp.sqrt(intermediate)))
    b = jax.random.normal(k4, (hidden,), dtype=jnp.float32) * 0.02
    gamma = jnp.ones((hidden,), dtype=jnp.float32)
    beta = jnp.zeros((hidden,), dtype=jnp.float32)

    out = bert_output(hidden_states, input_tensor, w_t, b, gamma, beta)
    out = jax.block_until_ready(out)

    # Pure-JAX reference using the same bf16-operand / f32-accumulate matmul
    # (this is the kernel's documented numerics contract).
    x_ref = jnp.dot(hidden_states.astype(jnp.bfloat16), w_t.astype(jnp.bfloat16),
                    preferred_element_type=jnp.float32) + b + input_tensor
    mu = x_ref.mean(-1, keepdims=True)
    var = ((x_ref - mu) ** 2).mean(-1, keepdims=True)
    ref = (x_ref - mu) / jnp.sqrt(var + 1e-12) * gamma + beta

    assert out.shape == ref.shape and out.dtype == ref.dtype
    assert jnp.allclose(out, ref, atol=1e-3, rtol=1e-3), "mismatch vs reference"
    print("KERNEL_OK")
</pallas_src>

<mosaic_0001>
module attributes {stable_mosaic.version = 11 : i64} {
  func.func @bert_output_kernel(%arg0: i32, %arg1: memref<8x64xf32, #tpu.memory_space<vmem>>, %arg2: memref<64x32xbf16, #tpu.memory_space<vmem>>, %arg3: memref<8x32xf32, #tpu.memory_space<vmem>>, %arg4: memref<8x32xf32, #tpu.memory_space<vmem>>, %arg5: memref<8x32xf32, #tpu.memory_space<vmem>>) attributes {dimension_semantics = [#tpu.dimension_semantics<parallel>], iteration_bounds = array<i64: 2>, scalar_prefetch = 0 : i64, scratch_operands = 0 : i64, tpu.core_type = #tpu.core_type<tc>, window_params = [{transform_indices = @transform_0, window_bounds = array<i64: 8, 64>}, {pipeline_mode = #tpu.pipeline_mode<synchronous>, transform_indices = @transform_1, window_bounds = array<i64: 64, 32>}, {pipeline_mode = #tpu.pipeline_mode<synchronous>, transform_indices = @transform_2, window_bounds = array<i64: 8, 32>}, {transform_indices = @transform_3, window_bounds = array<i64: 8, 32>}, {transform_indices = @transform_4, window_bounds = array<i64: 8, 32>}]} {
    %c0 = arith.constant 0 : index
    %c0_0 = arith.constant 0 : index
    %0 = vector.load %arg1[%c0, %c0_0] : memref<8x64xf32, #tpu.memory_space<vmem>>, vector<8x64xf32>
    %1 = arith.truncf %0 : vector<8x64xf32> to vector<8x64xbf16>
    %c0_1 = arith.constant 0 : index
    %c0_2 = arith.constant 0 : index
    %2 = vector.load %arg2[%c0_1, %c0_2] : memref<64x32xbf16, #tpu.memory_space<vmem>>, vector<64x32xbf16>
    %cst = arith.constant dense<0.000000e+00> : vector<8x32xf32>
    %3 = tpu.matmul %1, %2, %cst {dimension_numbers = #tpu.dot_dimension_numbers<[1], [0], [0], [1], [0, 0, 1, 1], [], []>} : vector<8x64xbf16>, vector<64x32xbf16>, vector<8x32xf32> -> vector<8x32xf32>
    %c0_3 = arith.constant 0 : index
    %c0_4 = arith.constant 0 : index
    %4 = vector.load %arg3[%c0_3, %c0_4] : memref<8x32xf32, #tpu.memory_space<vmem>>, vector<1x32xf32>
    %5 = vector.broadcast %4 : vector<1x32xf32> to vector<8x32xf32>
    %6 = arith.addf %3, %5 : vector<8x32xf32>
    %c0_5 = arith.constant 0 : index
    %c0_6 = arith.constant 0 : index
    %7 = vector.load %arg4[%c0_5, %c0_6] : memref<8x32xf32, #tpu.memory_space<vmem>>, vector<8x32xf32>
    %8 = arith.addf %6, %7 : vector<8x32xf32>
    %cst_7 = arith.constant dense<0.000000e+00> : vector<8xf32>
    %9 = vector.multi_reduction <add>, %8, %cst_7 [1] : vector<8x32xf32> to vector<8xf32>
    %10 = vector.shape_cast %9 : vector<8xf32> to vector<8x1xf32>
    %11 = arith.mulf %8, %8 : vector<8x32xf32>
    %cst_8 = arith.constant dense<0.000000e+00> : vector<8xf32>
    %12 = vector.multi_reduction <add>, %11, %cst_8 [1] : vector<8x32xf32> to vector<8xf32>
    %13 = vector.shape_cast %12 : vector<8xf32> to vector<8x1xf32>
    %cst_9 = arith.constant 3.125000e-02 : f32
    %14 = vector.broadcast %cst_9 : f32 to vector<8x1xf32>
    %15 = arith.mulf %10, %14 : vector<8x1xf32>
    %cst_10 = arith.constant 3.125000e-02 : f32
    %16 = vector.broadcast %cst_10 : f32 to vector<8x1xf32>
    %17 = arith.mulf %13, %16 : vector<8x1xf32>
    %18 = arith.mulf %15, %15 : vector<8x1xf32>
    %19 = arith.subf %17, %18 : vector<8x1xf32>
    %cst_11 = arith.constant 0.000000e+00 : f32
    %20 = vector.broadcast %cst_11 : f32 to vector<8x1xf32>
    %21 = arith.maximumf %19, %20 : vector<8x1xf32>
    %cst_12 = arith.constant 9.99999996E-13 : f32
    %22 = vector.broadcast %cst_12 : f32 to vector<8x1xf32>
    %23 = arith.addf %21, %22 : vector<8x1xf32>
    %24 = math.rsqrt %23 : vector<8x1xf32>
    %c1 = arith.constant 1 : index
    %c0_13 = arith.constant 0 : index
    %25 = vector.load %arg3[%c1, %c0_13] : memref<8x32xf32, #tpu.memory_space<vmem>>, vector<1x32xf32>
    %26 = vector.broadcast %24 : vector<8x1xf32> to vector<8x32xf32>
    %27 = vector.broadcast %25 : vector<1x32xf32> to vector<8x32xf32>
    %28 = arith.mulf %26, %27 : vector<8x32xf32>
    %c2 = arith.constant 2 : index
    %c0_14 = arith.constant 0 : index
    %29 = vector.load %arg3[%c2, %c0_14] : memref<8x32xf32, #tpu.memory_space<vmem>>, vector<1x32xf32>
    %30 = vector.broadcast %15 : vector<8x1xf32> to vector<8x32xf32>
    %31 = arith.mulf %30, %28 : vector<8x32xf32>
    %32 = vector.broadcast %29 : vector<1x32xf32> to vector<8x32xf32>
    %33 = arith.subf %32, %31 : vector<8x32xf32>
    %34 = arith.mulf %8, %28 : vector<8x32xf32>
    %35 = arith.addf %34, %33 : vector<8x32xf32>
    %c0_15 = arith.constant 0 : index
    %c0_16 = arith.constant 0 : index
    %36 = vector.load %arg5[%c0_15, %c0_16] : memref<8x32xf32, #tpu.memory_space<vmem>>, vector<8x32xf32>
    tpu.vector_store %arg5[%c0_15, %c0_16], %35 {strides = array<i32>} : memref<8x32xf32, #tpu.memory_space<vmem>>, vector<8x32xf32>,
    return
  }
  func.func @transform_0(%arg0: i32) -> (i32, i32) {
    %c0_i32 = arith.constant 0 : i32
    %c0_i32_0 = arith.constant 0 : i32
    return %arg0, %c0_i32 : i32, i32
  }
  func.func @transform_1(%arg0: i32) -> (i32, i32) {
    %c0_i32 = arith.constant 0 : i32
    %c0_i32_0 = arith.constant 0 : i32
    %c0_i32_1 = arith.constant 0 : i32
    return %c0_i32, %c0_i32_0 : i32, i32
  }
  func.func @transform_2(%arg0: i32) -> (i32, i32) {
    %c0_i32 = arith.constant 0 : i32
    %c0_i32_0 = arith.constant 0 : i32
    %c0_i32_1 = arith.constant 0 : i32
    return %c0_i32, %c0_i32_0 : i32, i32
  }
  func.func @transform_3(%arg0: i32) -> (i32, i32) {
    %c0_i32 = arith.constant 0 : i32
    %c0_i32_0 = arith.constant 0 : i32
    return %arg0, %c0_i32 : i32, i32
  }
  func.func @transform_4(%arg0: i32) -> (i32, i32) {
    %c0_i32 = arith.constant 0 : i32
    %c0_i32_0 = arith.constant 0 : i32
    return %arg0, %c0_i32 : i32, i32
  }
}

</mosaic_0001>

<bundles_post_ra>
// kernel: tpu_custom_call.1
= control target key start
LH: loop header
LB: loop body
LE: loop exit
PB: predicated region body
PF: predicated region fallthrough
CT: control target
= control target key end

     0   :  { %9 = vsyncpa [#allocation3], 0  ;;  %s664_s0 = inlined_call_operand.vmem [shape: f32[16,64], index: 0, kind: input, shape index: {}]   ;;  %s665_s1 = inlined_call_operand.vmem [shape: bf16[64,32], index: 1, kind: input, shape index: {}]   ;;  %s666_s2 = inlined_call_operand.vmem [shape: f32[8,32], index: 2, kind: input, shape index: {}]   ;;  %s667_s3 = inlined_call_operand.vmem [shape: f32[16,32], index: 3, kind: input, shape index: {}]   ;;  %s668_s4 = inlined_call_operand.hbm [shape: f32[16,32], index: 4, kind: output, shape index: {}]  }
   0x1   :  { %11 = vsyncpa [#allocation3 + $0x1], 0  ;;  %s552_s15 = smov 0   ;;  %s554_s16 = smov 0  }
   0x2   :  { %s556_s17 = smov 0   ;;  %s558_s18 = smov 0  }
   0x3 LB: > { %s573_s19 = sadd.s32 4294967295, %s525_s18   ;;  %s387_s20 = sadd.s32 4294967294, %s525_s18   ;;  %s525_s18 = sphi %s558_s18, %s674_s18   ;;  %s521_s17 = sphi %s556_s17, %s673_s17   ;;  %s517_s16 = sphi %s554_s16, %s672_s16   ;;  %s513_s15 = sphi %s552_s15, %s671_s15  }
   0x4   : > { %s577_s21 = sadd.s32 1, %s525_s18   ;;  %s118_s22 = sadd.s32 1, %s521_s17 }
   0x5   : > { %s115_s23 = ssub.s32 %s525_s18, %s577_s21  ;;  %p128_p0 = scmp.ne.s32.totalorder %s521_s17, %s517_s16 }
   0x6   : > { %p116_p1 = scmp.eq.s32.totalorder %s115_s23, 0  ;;  %p129_p2 = scmp.eq.s32.totalorder %s573_s19, 1 }
   0x7   : > { %p134_p3 = scmp.ne.s32.totalorder %s517_s16, %s513_s15  ;;  %p135_p4 = scmp.eq.s32.totalorder %s387_s20, 1 }
   0x8   : > { %s588_s24 = scalar_select %p116_p1, %s521_s17, %s118_s22  }
   0x9   : > { %p590_p5 = por %p129_p2, %p128_p0  ;;  %p594_p6 = por %p135_p4, %p134_p3 }
   0xa   : > { %p390_p7 = scmp.ge.s32.totalorder %s525_s18, 1  ;;  %p173_p8 = scmp.lt.s32.totalorder %s525_s18, 3 }
   0xc   : > { %p174_p9 = pnand %p390_p7, %p173_p8 }
   0xd   : > { %p202_p10 = scmp.lt.s32.totalorder (!%p174_p9), %s573_s19, 1  ;;  %s199_s28 = sand.u32 (!%p174_p9), 1, %s517_s16  }
   0xe   : > { %177 = sbr.rel (%p174_p9) target bundleno = 327 (0x147), region = 36  ;;  %s483_s29 = scalar_lea.hbm (!%p174_p9), %s668_s4, 16 }
  0x13   : > { %v418_v0 = vld [vmem:[%s665_s1 + $0x18] sm:$0xff]  ;;  %v417_v1 = vld [vmem:[%s665_s1 + $0x10] sm:$0xff]  ;;  %s203_s5 = scalar_select %p202_p10, %s573_s19, 1  ;;  %v416_v2 = vld [vmem:[%s665_s1 + $0x8] sm:$0xff]  ;;  %vm247_vm0 = vcmask 523264   ;;  %vm266_vm1 = vcmask 261120  }
  0x14   : > { %255 = vmatpush.bf16.msra.mxu0 %v418_v0  ;;  %v415_v3 = vld [vmem:[%s665_s1] sm:$0xff] }
  0x15   : > { %s392_s6 = sshll.u32 %s203_s5, 3  ;;  %v458_v6 = vld [vmem:[%s666_s2] ss:$0 sm:$0xff]  ;;  %v459_v28 = vld [vmem:[%s666_s2 + $0x1] ss:$0 sm:$0xff]  ;;  %s391_s5 = sshll.u32 %s199_s28, 3 }
  0x16   : > { %s205_s11 = scalar_lea.vmem %s664_s0, %s392_s6  ;;  %s209_s22 = scalar_lea.vmem %s667_s3, %s392_s6  ;;  %v460_v32 = vld [vmem:[%s666_s2 + $0x2] ss:$0 sm:$0xff] }
  0x17   : > { %v211_v4 = vld [vmem:[%s205_s11] sm:$0xff]  ;;  %s412_s6 = sshll.u32 %s573_s19, 3  ;;  %s201_s12 = scalar_lea.vmem [#allocation2], %s391_s5 }
  0x18   : > { %256 = vmatpush.bf16.msra.mxu0 %v417_v1  ;;  %v212_v5 = vpack.c.bf16 %v211_v4, %v211_v4  ;;  %v264_v8 = vld [vmem:[%s209_s22] sm:$0xff]  ;;  %s311_s11 = scalar_lea.hbm %s668_s4, %s412_s6  ;;  %s313_s13 = sshll.u32 %s201_s12, 4  ;;  %s314_s13 = int_to_ptr.vmem [resolvable:$true] %s313_s13 }
  0x19   : > { %s315_s14 = sshll.u32 %s311_s11, 4  ;;  %s301_s19 = scalar_lea.sflag [#allocation3], %s199_s28  ;;  %s316_s14 = int_to_ptr.hbm [resolvable:$true] %s315_s14 }
  0x1a   : > { %s477_s20 = sshra.s32 %s316_s14, 4  ;;  %s478_s20 = int_to_ptr.hbm [resolvable:$true] %s477_s20 }
  0x1b   : > { %s479_s22 = scalar_lea.hbm %s478_s20, 8  ;;  %p484_p0 = scmp.lt.s32.totalorder %s478_s20, %s668_s4 }
  0x1c   : > { %257 = vmatpush.bf16.msra.mxu0 %v416_v2  ;;  %p480_p11 = scmp.ne.s32.totalorder %s478_s20, %s479_s22  ;;  %p485_p1 = scmp.lt.s32.totalorder %s483_s29, %s479_s22 }
  0x1e   : > { %p481_p12 = pnand %p480_p11, %p590_p5  ;;  %p486_p2 = por %p485_p1, %p484_p0 }
  0x20   : > { %258 = vmatpush.bf16.msra.mxu0 %v415_v3  ;;  %p482_p13 = pneg %p481_p12 }
  0x22   : > { %p487_p3 = pnand %p486_p2, %p482_p13 }
  0x23   : > { %410 = vmatmul.msk.bf16.vlgmr.msra.gmra.mxu0 %vm247_vm0, %v212_v5 }
  0xa0   : > { %v260_v7 = vpop.f32.mrf.mxu0 }
  0xa1   : > { %v261_v9 = vadd.f32 %v458_v6, %v260_v7 }
  0xa3   : > { %v265_v10 = vadd.f32 %v264_v8, %v261_v9 }
  0xa5   : > { %v267_v11 = vsel %vm266_vm1, %v265_v10, 0.0  ;;  %v270_v13 = vmul.f32 %v265_v10, %v265_v10 }
  0xa6   : > { %268 = vadd.xlane.f32.xlu0 %v267_v11 }
  0xa7   : > { %v271_v14 = vsel %vm266_vm1, %v270_v13, 0.0 }
  0xa8   : > { %v262_v12 = vpop.f32.mrf.mxu0 }
  0xae   : > { %272 = vadd.xlane.f32.xlu0 %v271_v14 }
 0x119   : > { %v269_v15 = vpop.xlane.xlu0 %268 }
 0x11a   : > { %v274_v16 = vmul.f32 0.03125, %v269_v15 }
 0x11c   : > { %v276_v18 = vmul.f32 %v274_v16, %v274_v16 }
 0x121   : > { %v273_v17 = vpop.xlane.xlu0 %272 }
 0x122   : > { %v275_v19 = vmul.f32 0.03125, %v273_v17 }
 0x124   : > { %v277_v20 = vsub.f32 %v275_v19, %v276_v18 }
 0x126   : > { %v278_v21 = vmax.f32 %v277_v20, 0.0 }
 0x128   : > { %v279_v22 = vadd.f32 1e-12, %v278_v21 }
 0x12a   : > { %461 = vrsqrt.f32 %v279_v22  ;;  %vm286_vm3 = vweird.f32 %v279_v22 }
 0x130   : > { %v462_v23 = vpop.eup %461 }
 0x131   : > { %v281_v24 = vmul.f32 %v462_v23, %v279_v22  ;;  %vm287_vm2 = vweird.f32 %v462_v23 }
 0x132   : > { %vm288_vm4 = vmor %vm286_vm3, %vm287_vm2 }
 0x133   : > { %v282_v25 = vmul.f32 %v462_v23, %v281_v24 }
 0x135   : > { %v283_v26 = vmul.f32 0.5, %v282_v25 }
 0x137   : > { %v284_v27 = vsub.f32 1.5, %v283_v26 }
 0x139   : > { %v285_v29 = vmul.f32 %v462_v23, %v284_v27 }
 0x13b   : > { %v289_v30 = vsel %vm288_vm4, %v462_v23, %v285_v29 }
 0x13c   : > { %v292_v31 = vmul.f32 %v459_v28, %v289_v30 }
 0x13e   : > { %v294_v33 = vmul.f32 %v292_v31, %v274_v16  ;;  %v297_v35 = vmul.f32 %v292_v31, %v265_v10 }
 0x140   : > { %v296_v34 = vsub.f32 %v460_v32, %v294_v33 }
 0x142   : > { %v298_v36 = vadd.f32 %v297_v35, %v296_v34 }
 0x144   : > { %299 = vst.msk [vmem:[%s201_s12] sm:$0xff] %vm266_vm1, %v298_v36 }
 0x145   : > { %490 = shalt.err (!%p487_p3)
}
 0x146   : > { %419 = dma.vmem_to_hbm [thread:$0]  (%p590_p5), %s314_s13, 128, %s316_s14, %s301_s19  }
 0x147 PF: > { %p425_p4 = scmp.ge.s32.totalorder %s525_s18, 2  ;;  %s327_s28 = sand.u32 1, %s513_s15  }
 0x148   : > { %s328_s6 = scalar_lea.sflag [#allocation3], %s327_s28 }
 0x149   : > { %p422_p7 = pnand %p425_p4, %p594_p6 }
 0x14b   : > { %p423_p8 = pneg %p422_p7 }
 0x14d   : > { %508 = dma.done.wait (%p423_p8), %s328_s6, 128  }
 0x14e   : > { %510 = vsyncadd (%p423_p8), %s328_s6, 4294967168  ;;  %p14_p9 = scmp.ge.s32.totalorder %s577_s21, 4   ;;  %s671_s15 = smov %s517_s16 }
 0x14f   : > { %s672_s16 = smov %s521_s17  ;;  %s673_s17 = smov %s588_s24 }
 0x150   : > { %s674_s18 = smov %s577_s21  ;;  %16 = sbr.rel (!%p14_p9) target bundleno = 3 (0x3), region = 74 }
 0x155   :  { %334 = vsyncpa [#allocation3], 1 }
 0x156   :  { %336 = vsyncpa [#allocation3 + $0x1], 1 }

</bundles_post_ra>
